<compile_context>
chip_gen: v7x
topology: tpu7x:2x2x1
jax: 0.10.0
libtpu: 0.0.40
codegen_flags: <defaults>
</compile_context>

<pallas_src>
import jax
import jax.numpy as jnp
from jax.experimental import pallas as pl
from jax.experimental.pallas import tpu as pltpu


def _bilinear_matrix(n_in: int, n_out: int) -> jnp.ndarray:
    """1-D bilinear interpolation matrix, PyTorch align_corners=False."""
    i = jnp.arange(n_out, dtype=jnp.float32)
    src = (i + 0.5) * (n_in / n_out) - 0.5
    src = jnp.clip(src, 0.0, n_in - 1.0)
    lo = jnp.floor(src).astype(jnp.int32)
    hi = jnp.minimum(lo + 1, n_in - 1)
    w_hi = src - lo.astype(jnp.float32)
    w_lo = 1.0 - w_hi
    m = jnp.zeros((n_out, n_in), dtype=jnp.float32)
    m = m.at[jnp.arange(n_out), lo].add(w_lo)
    m = m.at[jnp.arange(n_out), hi].add(w_hi)
    return m


def _count_kernel(a12_ref, a24_ref, a48_ref, mask_ref, text_ref,
                  up12_ref, up24_ref, fused_ref, tpool_ref):
    f32 = jnp.float32
    m = mask_ref[...].astype(f32)                       # (bt, T, 1)
    inv_msum = 1.0 / jnp.sum(m, axis=1)                 # (bt, 1)

    def masked_mean(ref):
        # Stream the tile in its input dtype, cast per-vreg, pool over tokens.
        x = ref[...].astype(f32)                        # (bt, T, X)
        return jnp.sum(x * m, axis=1) * inv_msum        # (bt, X)

    # Token pooling BEFORE upsampling (linear ops commute) -> T-fold FLOP cut.
    p12 = masked_mean(a12_ref)                          # (bt, h12*w12)
    p24 = masked_mean(a24_ref)                          # (bt, h24*w24)
    p48 = masked_mean(a48_ref)                          # (bt, H*W)
    tpool_ref[...] = masked_mean(text_ref).astype(tpool_ref.dtype)  # (bt, D)

    # Bilinear upsample of the pooled maps: tiny (bt, K) @ (K, S) MXU matmuls.
    u12 = jnp.dot(p12, up12_ref[...], preferred_element_type=f32)   # (bt, S)
    u24 = jnp.dot(p24, up24_ref[...], preferred_element_type=f32)   # (bt, S)

    def mmnorm(x):  # row-wise (per-batch) min-max normalization
        x_min = jnp.min(x, axis=1, keepdims=True)
        x_max = jnp.max(x, axis=1, keepdims=True)
        return (x - x_min) * (1.0 / (x_max - x_min + 1e-7))

    fused_ref[...] = (0.1 * mmnorm(p48) + 0.3 * mmnorm(u24)
                      + 0.6 * mmnorm(u12)).astype(fused_ref.dtype)


def count_fused_attn(attn12, attn24, attn48, prompt_attn_mask, text_feat,
                     *, batch_block=None, vmem_limit_bytes=None):
    B, T, h12, w12 = attn12.shape
    _, _, h24, w24 = attn24.shape
    _, _, H, W = attn48.shape
    D = text_feat.shape[-1]
    K12, K24, S = h12 * w12, h24 * w24, H * W

    if batch_block is None:
        batch_block = B if B <= 8 else 8
    bt = batch_block
    # Output blocks put bt on the sublane axis -> must be full or 8-aligned.
    assert bt == B or bt % 8 == 0, "batch_block must equal B or be a multiple of 8"
    grid_b = pl.cdiv(B, bt)

    # Grid-constant flattened upsample operators, applied AFTER pooling.
    up12 = jnp.kron(_bilinear_matrix(h12, H), _bilinear_matrix(w12, W)).T  # (K12, S)
    up24 = jnp.kron(_bilinear_matrix(h24, H), _bilinear_matrix(w24, W)).T  # (K24, S)

    # Free, layout-preserving reshapes only — no host-side dtype casts.
    a12 = attn12.reshape(B, T, K12)
    a24 = attn24.reshape(B, T, K24)
    a48 = attn48.reshape(B, T, S)
    mask = prompt_attn_mask.reshape(B, T, 1)

    fused, tpool = pl.pallas_call(
        _count_kernel,
        out_shape=(jax.ShapeDtypeStruct((B, S), jnp.float32),
                   jax.ShapeDtypeStruct((B, D), text_feat.dtype)),
        grid_spec=pltpu.PrefetchScalarGridSpec(
            num_scalar_prefetch=0,
            grid=(grid_b,),
            in_specs=[
                pl.BlockSpec((bt, T, K12), lambda b: (b, 0, 0)),
                pl.BlockSpec((bt, T, K24), lambda b: (b, 0, 0)),
                pl.BlockSpec((bt, T, S), lambda b: (b, 0, 0)),
                pl.BlockSpec((bt, T, 1), lambda b: (b, 0, 0)),
                pl.BlockSpec((bt, T, D), lambda b: (b, 0, 0)),
                pl.BlockSpec((K12, S), lambda b: (0, 0)),   # grid-constant
                pl.BlockSpec((K24, S), lambda b: (0, 0)),   # grid-constant
            ],
            out_specs=(pl.BlockSpec((bt, S), lambda b: (b, 0)),
                       pl.BlockSpec((bt, D), lambda b: (b, 0))),
        ),
        compiler_params=pltpu.CompilerParams(
            dimension_semantics=("parallel",),
            vmem_limit_bytes=vmem_limit_bytes),
    )(a12, a24, a48, mask, text_feat, up12, up24)

    fused_attn = fused.reshape(B, 1, H, W)
    text_pooled = tpool.reshape(B, D)
    return fused_attn, text_pooled


def _reference(attn12, attn24, attn48, prompt_attn_mask, text_feat):
    """Pure-JAX reference in the ORIGINAL op order (upsample -> pool -> norm)."""
    B, T, h12, w12 = attn12.shape
    _, _, h24, w24 = attn24.shape
    _, _, H, W = attn48.shape
    S = H * W
    up12 = jnp.kron(_bilinear_matrix(h12, H), _bilinear_matrix(w12, W)).T
    up24 = jnp.kron(_bilinear_matrix(h24, H), _bilinear_matrix(w24, W)).T
    m = prompt_attn_mask.reshape(B, T, 1)
    a12u = attn12.reshape(B, T, -1) @ up12
    a24u = attn24.reshape(B, T, -1) @ up24
    a48f = attn48.reshape(B, T, S)
    msum = jnp.sum(m, axis=1, keepdims=True)
    p12 = jnp.sum(a12u * m, axis=1, keepdims=True) / msum
    p24 = jnp.sum(a24u * m, axis=1, keepdims=True) / msum
    p48 = jnp.sum(a48f * m, axis=1, keepdims=True) / msum

    def mmnorm(x):
        x_min = jnp.min(x, axis=(1, 2), keepdims=True)
        x_max = jnp.max(x, axis=(1, 2), keepdims=True)
        return (x - x_min) / (x_max - x_min + 1e-7)

    fused = 0.1 * mmnorm(p48) + 0.3 * mmnorm(p24) + 0.6 * mmnorm(p12)
    tpool = jnp.sum(text_feat * m, axis=1) / msum[:, 0]
    return fused.reshape(B, 1, H, W), tpool


if __name__ == "__main__":
    B, T, D = 2, 8, 32
    h12, h24, H = 4, 8, 16  # small spatial sizes; attn12 x4 and attn24 x2 -> H

    key = jax.random.PRNGKey(0)
    k1, k2, k3, k4, k5 = jax.random.split(key, 5)
    attn12 = jax.random.normal(k1, (B, T, h12, h12), dtype=jnp.float32)
    attn24 = jax.random.normal(k2, (B, T, h24, h24), dtype=jnp.float32)
    attn48 = jax.random.normal(k3, (B, T, H, H), dtype=jnp.float32)
    text_feat = jax.random.normal(k4, (B, T, D), dtype=jnp.float32)
    mask = (jax.random.uniform(k5, (B, T, 1, 1)) > 0.3).astype(jnp.float32)
    mask = mask.at[:, 0].set(1.0)  # at least one active token per batch

    fused_attn, text_pooled = count_fused_attn(
        attn12, attn24, attn48, mask, text_feat)
    jax.block_until_ready((fused_attn, text_pooled))

    ref_fused, ref_tpool = _reference(attn12, attn24, attn48, mask, text_feat)
    assert jnp.allclose(fused_attn, ref_fused, atol=2e-3, rtol=2e-3)
    assert jnp.allclose(text_pooled, ref_tpool, atol=2e-3, rtol=2e-3)

    print("KERNEL_OK")
</pallas_src>

<mosaic_0001>
module attributes {stable_mosaic.version = 11 : i64} {
  func.func @_count_kernel(%arg0: i32, %arg1: memref<2x8x16xf32, #tpu.memory_space<vmem>>, %arg2: memref<2x8x64xf32, #tpu.memory_space<vmem>>, %arg3: memref<2x8x256xf32, #tpu.memory_space<vmem>>, %arg4: memref<2x8x1xf32, #tpu.memory_space<vmem>>, %arg5: memref<2x8x32xf32, #tpu.memory_space<vmem>>, %arg6: memref<16x256xf32, #tpu.memory_space<vmem>>, %arg7: memref<64x256xf32, #tpu.memory_space<vmem>>, %arg8: memref<2x256xf32, #tpu.memory_space<vmem>>, %arg9: memref<2x32xf32, #tpu.memory_space<vmem>>) attributes {dimension_semantics = [#tpu.dimension_semantics<parallel>], iteration_bounds = array<i64: 1>, scalar_prefetch = 0 : i64, scratch_operands = 0 : i64, tpu.core_type = #tpu.core_type<tc>, window_params = [{transform_indices = @transform_0, window_bounds = array<i64: 2, 8, 16>}, {transform_indices = @transform_1, window_bounds = array<i64: 2, 8, 64>}, {transform_indices = @transform_2, window_bounds = array<i64: 2, 8, 256>}, {transform_indices = @transform_3, window_bounds = array<i64: 2, 8, 1>}, {transform_indices = @transform_4, window_bounds = array<i64: 2, 8, 32>}, {pipeline_mode = #tpu.pipeline_mode<synchronous>, transform_indices = @transform_5, window_bounds = array<i64: 16, 256>}, {pipeline_mode = #tpu.pipeline_mode<synchronous>, transform_indices = @transform_6, window_bounds = array<i64: 64, 256>}, {transform_indices = @transform_7, window_bounds = array<i64: 2, 256>}, {transform_indices = @transform_8, window_bounds = array<i64: 2, 32>}]} {
    %c0 = arith.constant 0 : index
    %c0_0 = arith.constant 0 : index
    %c0_1 = arith.constant 0 : index
    %0 = vector.load %arg4[%c0, %c0_0, %c0_1] : memref<2x8x1xf32, #tpu.memory_space<vmem>>, vector<2x8x1xf32>
    %cst = arith.constant dense<0.000000e+00> : vector<2x1xf32>
    %1 = vector.multi_reduction <add>, %0, %cst [1] : vector<2x8x1xf32> to vector<2x1xf32>
    %cst_2 = arith.constant 1.000000e+00 : f32
    %2 = vector.broadcast %cst_2 : f32 to vector<2x1xf32>
    %3 = arith.divf %2, %1 : vector<2x1xf32>
    %c0_3 = arith.constant 0 : index
    %c0_4 = arith.constant 0 : index
    %c0_5 = arith.constant 0 : index
    %4 = vector.load %arg1[%c0_3, %c0_4, %c0_5] : memref<2x8x16xf32, #tpu.memory_space<vmem>>, vector<2x8x16xf32>
    %5 = vector.broadcast %0 : vector<2x8x1xf32> to vector<2x8x16xf32>
    %6 = arith.mulf %4, %5 : vector<2x8x16xf32>
    %cst_6 = arith.constant dense<0.000000e+00> : vector<2x16xf32>
    %7 = vector.multi_reduction <add>, %6, %cst_6 [1] : vector<2x8x16xf32> to vector<2x16xf32>
    %8 = vector.broadcast %3 : vector<2x1xf32> to vector<2x16xf32>
    %9 = arith.mulf %7, %8 : vector<2x16xf32>
    %c0_7 = arith.constant 0 : index
    %c0_8 = arith.constant 0 : index
    %c0_9 = arith.constant 0 : index
    %10 = vector.load %arg2[%c0_7, %c0_8, %c0_9] : memref<2x8x64xf32, #tpu.memory_space<vmem>>, vector<2x8x64xf32>
    %11 = vector.broadcast %0 : vector<2x8x1xf32> to vector<2x8x64xf32>
    %12 = arith.mulf %10, %11 : vector<2x8x64xf32>
    %cst_10 = arith.constant dense<0.000000e+00> : vector<2x64xf32>
    %13 = vector.multi_reduction <add>, %12, %cst_10 [1] : vector<2x8x64xf32> to vector<2x64xf32>
    %14 = vector.broadcast %3 : vector<2x1xf32> to vector<2x64xf32>
    %15 = arith.mulf %13, %14 : vector<2x64xf32>
    %c0_11 = arith.constant 0 : index
    %c0_12 = arith.constant 0 : index
    %c0_13 = arith.constant 0 : index
    %16 = vector.load %arg3[%c0_11, %c0_12, %c0_13] : memref<2x8x256xf32, #tpu.memory_space<vmem>>, vector<2x8x256xf32>
    %17 = vector.broadcast %0 : vector<2x8x1xf32> to vector<2x8x256xf32>
    %18 = arith.mulf %16, %17 : vector<2x8x256xf32>
    %cst_14 = arith.constant dense<0.000000e+00> : vector<2x256xf32>
    %19 = vector.multi_reduction <add>, %18, %cst_14 [1] : vector<2x8x256xf32> to vector<2x256xf32>
    %20 = vector.broadcast %3 : vector<2x1xf32> to vector<2x256xf32>
    %21 = arith.mulf %19, %20 : vector<2x256xf32>
    %c0_15 = arith.constant 0 : index
    %c0_16 = arith.constant 0 : index
    %c0_17 = arith.constant 0 : index
    %22 = vector.load %arg5[%c0_15, %c0_16, %c0_17] : memref<2x8x32xf32, #tpu.memory_space<vmem>>, vector<2x8x32xf32>
    %23 = vector.broadcast %0 : vector<2x8x1xf32> to vector<2x8x32xf32>
    %24 = arith.mulf %22, %23 : vector<2x8x32xf32>
    %cst_18 = arith.constant dense<0.000000e+00> : vector<2x32xf32>
    %25 = vector.multi_reduction <add>, %24, %cst_18 [1] : vector<2x8x32xf32> to vector<2x32xf32>
    %26 = vector.broadcast %3 : vector<2x1xf32> to vector<2x32xf32>
    %27 = arith.mulf %25, %26 : vector<2x32xf32>
    %c0_19 = arith.constant 0 : index
    %c0_20 = arith.constant 0 : index
    %28 = vector.load %arg9[%c0_19, %c0_20] : memref<2x32xf32, #tpu.memory_space<vmem>>, vector<2x32xf32>
    tpu.vector_store %arg9[%c0_19, %c0_20], %27 {strides = array<i32>} : memref<2x32xf32, #tpu.memory_space<vmem>>, vector<2x32xf32>,
    %c0_21 = arith.constant 0 : index
    %c0_22 = arith.constant 0 : index
    %29 = vector.load %arg6[%c0_21, %c0_22] : memref<16x256xf32, #tpu.memory_space<vmem>>, vector<16x256xf32>
    %cst_23 = arith.constant dense<0.000000e+00> : vector<2x256xf32>
    %30 = tpu.matmul %9, %29, %cst_23 {dimension_numbers = #tpu.dot_dimension_numbers<[1], [0], [0], [1], [0, 0, 1, 1], [], []>} : vector<2x16xf32>, vector<16x256xf32>, vector<2x256xf32> -> vector<2x256xf32>
    %c0_24 = arith.constant 0 : index
    %c0_25 = arith.constant 0 : index
    %31 = vector.load %arg7[%c0_24, %c0_25] : memref<64x256xf32, #tpu.memory_space<vmem>>, vector<64x256xf32>
    %cst_26 = arith.constant dense<0.000000e+00> : vector<2x256xf32>
    %32 = tpu.matmul %15, %31, %cst_26 {dimension_numbers = #tpu.dot_dimension_numbers<[1], [0], [0], [1], [0, 0, 1, 1], [], []>} : vector<2x64xf32>, vector<64x256xf32>, vector<2x256xf32> -> vector<2x256xf32>
    %cst_27 = arith.constant dense<0x7F800000> : vector<2xf32>
    %33 = vector.multi_reduction <minimumf>, %21, %cst_27 [1] : vector<2x256xf32> to vector<2xf32>
    %34 = vector.shape_cast %33 : vector<2xf32> to vector<2x1xf32>
    %cst_28 = arith.constant dense<0xFF800000> : vector<2xf32>
    %35 = vector.multi_reduction <maximumf>, %21, %cst_28 [1] : vector<2x256xf32> to vector<2xf32>
    %36 = vector.shape_cast %35 : vector<2xf32> to vector<2x1xf32>
    %37 = vector.broadcast %34 : vector<2x1xf32> to vector<2x256xf32>
    %38 = arith.subf %21, %37 : vector<2x256xf32>
    %39 = arith.subf %36, %34 : vector<2x1xf32>
    %cst_29 = arith.constant 1.000000e-07 : f32
    %40 = vector.broadcast %cst_29 : f32 to vector<2x1xf32>
    %41 = arith.addf %39, %40 : vector<2x1xf32>
    %cst_30 = arith.constant 1.000000e+00 : f32
    %42 = vector.broadcast %cst_30 : f32 to vector<2x1xf32>
    %43 = arith.divf %42, %41 : vector<2x1xf32>
    %44 = vector.broadcast %43 : vector<2x1xf32> to vector<2x256xf32>
    %45 = arith.mulf %38, %44 : vector<2x256xf32>
    %cst_31 = arith.constant 1.000000e-01 : f32
    %46 = vector.broadcast %cst_31 : f32 to vector<2x256xf32>
    %47 = arith.mulf %46, %45 : vector<2x256xf32>
    %cst_32 = arith.constant dense<0x7F800000> : vector<2xf32>
    %48 = vector.multi_reduction <minimumf>, %32, %cst_32 [1] : vector<2x256xf32> to vector<2xf32>
    %49 = vector.shape_cast %48 : vector<2xf32> to vector<2x1xf32>
    %cst_33 = arith.constant dense<0xFF800000> : vector<2xf32>
    %50 = vector.multi_reduction <maximumf>, %32, %cst_33 [1] : vector<2x256xf32> to vector<2xf32>
    %51 = vector.shape_cast %50 : vector<2xf32> to vector<2x1xf32>
    %52 = vector.broadcast %49 : vector<2x1xf32> to vector<2x256xf32>
    %53 = arith.subf %32, %52 : vector<2x256xf32>
    %54 = arith.subf %51, %49 : vector<2x1xf32>
    %cst_34 = arith.constant 1.000000e-07 : f32
    %55 = vector.broadcast %cst_34 : f32 to vector<2x1xf32>
    %56 = arith.addf %54, %55 : vector<2x1xf32>
    %cst_35 = arith.constant 1.000000e+00 : f32
    %57 = vector.broadcast %cst_35 : f32 to vector<2x1xf32>
    %58 = arith.divf %57, %56 : vector<2x1xf32>
    %59 = vector.broadcast %58 : vector<2x1xf32> to vector<2x256xf32>
    %60 = arith.mulf %53, %59 : vector<2x256xf32>
    %cst_36 = arith.constant 3.000000e-01 : f32
    %61 = vector.broadcast %cst_36 : f32 to vector<2x256xf32>
    %62 = arith.mulf %61, %60 : vector<2x256xf32>
    %63 = arith.addf %47, %62 : vector<2x256xf32>
    %cst_37 = arith.constant dense<0x7F800000> : vector<2xf32>
    %64 = vector.multi_reduction <minimumf>, %30, %cst_37 [1] : vector<2x256xf32> to vector<2xf32>
    %65 = vector.shape_cast %64 : vector<2xf32> to vector<2x1xf32>
    %cst_38 = arith.constant dense<0xFF800000> : vector<2xf32>
    %66 = vector.multi_reduction <maximumf>, %30, %cst_38 [1] : vector<2x256xf32> to vector<2xf32>
    %67 = vector.shape_cast %66 : vector<2xf32> to vector<2x1xf32>
    %68 = vector.broadcast %65 : vector<2x1xf32> to vector<2x256xf32>
    %69 = arith.subf %30, %68 : vector<2x256xf32>
    %70 = arith.subf %67, %65 : vector<2x1xf32>
    %cst_39 = arith.constant 1.000000e-07 : f32
    %71 = vector.broadcast %cst_39 : f32 to vector<2x1xf32>
    %72 = arith.addf %70, %71 : vector<2x1xf32>
    %cst_40 = arith.constant 1.000000e+00 : f32
    %73 = vector.broadcast %cst_40 : f32 to vector<2x1xf32>
    %74 = arith.divf %73, %72 : vector<2x1xf32>
    %75 = vector.broadcast %74 : vector<2x1xf32> to vector<2x256xf32>
    %76 = arith.mulf %69, %75 : vector<2x256xf32>
    %cst_41 = arith.constant 6.000000e-01 : f32
    %77 = vector.broadcast %cst_41 : f32 to vector<2x256xf32>
    %78 = arith.mulf %77, %76 : vector<2x256xf32>
    %79 = arith.addf %63, %78 : vector<2x256xf32>
    %c0_42 = arith.constant 0 : index
    %c0_43 = arith.constant 0 : index
    %80 = vector.load %arg8[%c0_42, %c0_43] : memref<2x256xf32, #tpu.memory_space<vmem>>, vector<2x256xf32>
    tpu.vector_store %arg8[%c0_42, %c0_43], %79 {strides = array<i32>} : memref<2x256xf32, #tpu.memory_space<vmem>>, vector<2x256xf32>,
    return
  }
  func.func @transform_0(%arg0: i32) -> (i32, i32, i32) {
    %c0_i32 = arith.constant 0 : i32
    %c0_i32_0 = arith.constant 0 : i32
    %c0_i32_1 = arith.constant 0 : i32
    return %arg0, %c0_i32, %c0_i32_0 : i32, i32, i32
  }
  func.func @transform_1(%arg0: i32) -> (i32, i32, i32) {
    %c0_i32 = arith.constant 0 : i32
    %c0_i32_0 = arith.constant 0 : i32
    %c0_i32_1 = arith.constant 0 : i32
    return %arg0, %c0_i32, %c0_i32_0 : i32, i32, i32
  }
  func.func @transform_2(%arg0: i32) -> (i32, i32, i32) {
    %c0_i32 = arith.constant 0 : i32
    %c0_i32_0 = arith.constant 0 : i32
    %c0_i32_1 = arith.constant 0 : i32
    return %arg0, %c0_i32, %c0_i32_0 : i32, i32, i32
  }
  func.func @transform_3(%arg0: i32) -> (i32, i32, i32) {
    %c0_i32 = arith.constant 0 : i32
    %c0_i32_0 = arith.constant 0 : i32
    %c0_i32_1 = arith.constant 0 : i32
    return %arg0, %c0_i32, %c0_i32_0 : i32, i32, i32
  }
  func.func @transform_4(%arg0: i32) -> (i32, i32, i32) {
    %c0_i32 = arith.constant 0 : i32
    %c0_i32_0 = arith.constant 0 : i32
    %c0_i32_1 = arith.constant 0 : i32
    return %arg0, %c0_i32, %c0_i32_0 : i32, i32, i32
  }
  func.func @transform_5(%arg0: i32) -> (i32, i32) {
    %c0_i32 = arith.constant 0 : i32
    %c0_i32_0 = arith.constant 0 : i32
    %c0_i32_1 = arith.constant 0 : i32
    return %c0_i32, %c0_i32_0 : i32, i32
  }
  func.func @transform_6(%arg0: i32) -> (i32, i32) {
    %c0_i32 = arith.constant 0 : i32
    %c0_i32_0 = arith.constant 0 : i32
    %c0_i32_1 = arith.constant 0 : i32
    return %c0_i32, %c0_i32_0 : i32, i32
  }
  func.func @transform_7(%arg0: i32) -> (i32, i32) {
    %c0_i32 = arith.constant 0 : i32
    %c0_i32_0 = arith.constant 0 : i32
    return %arg0, %c0_i32 : i32, i32
  }
  func.func @transform_8(%arg0: i32) -> (i32, i32) {
    %c0_i32 = arith.constant 0 : i32
    %c0_i32_0 = arith.constant 0 : i32
    return %arg0, %c0_i32 : i32, i32
  }
}

</mosaic_0001>

<bundles_post_ra>
// kernel: tpu_custom_call.1
= control target key start
LH: loop header
LB: loop body
LE: loop exit
PB: predicated region body
PF: predicated region fallthrough
CT: control target
= control target key end

     0   :  { %14 = vsyncpa [#allocation3], 0  ;;  %s1037_s0 = inlined_call_operand.hbm [shape: f32[2,8,16], index: 0, kind: input, shape index: {}]   ;;  %s1038_s1 = inlined_call_operand.hbm [shape: f32[2,8,64], index: 1, kind: input, shape index: {}]   ;;  %s1039_s2 = inlined_call_operand.hbm [shape: f32[2,8,256], index: 2, kind: input, shape index: {}]   ;;  %s1040_s3 = inlined_call_operand.vmem [shape: f32[2,8,1], index: 3, kind: input, shape index: {}]   ;;  %s1041_s4 = inlined_call_operand.hbm [shape: f32[2,8,32], index: 4, kind: input, shape index: {}]   ;;  %s1042_s5 = inlined_call_operand.vmem [shape: f32[16,256], index: 5, kind: input, shape index: {}]   ;;  %s1043_s6 = inlined_call_operand.hbm [shape: f32[64,256], index: 6, kind: input, shape index: {}]   ;;  %s1044_s7 = inlined_call_operand.hbm [shape: f32[2,256], index: 7, kind: output, shape index: {0}]   ;;  %s1045_s8 = inlined_call_operand.hbm [shape: f32[2,32], index: 8, kind: output, shape index: {1}]  }
   0x1   :  { %15 = vsyncpa [#allocation6], 0 }
   0x2   :  { %16 = vsyncpa [#allocation9], 0 }
   0x3   :  { %17 = vsyncpa [#allocation4], 0 }
   0x4   :  { %18 = vsyncpa [#allocation13], 0  ;;  %s801_s27 = smov [#allocation5]   ;;  %s802_s29 = smov [#allocation8]  }
   0x5   :  { %s36_s28 = sshll.u32 %s801_s27, 4  ;;  %s62_s30 = sshll.u32 %s802_s29, 4  ;;  %s37_s28 = int_to_ptr.vmem [resolvable:$true] %s36_s28  ;;  %s860_s30 = int_to_ptr.vmem [resolvable:$true] %s62_s30 }
   0x6   :  { %s637_s11 = scalar_lea.hbm %s1038_s1, 256 }
   0x7   :  { %p638_p0 = scmp.ne.s32.totalorder %s1038_s1, %s637_s11  ;;  %p641_p1 = scmp.lt.u32.totalorder %s637_s11, %s1038_s1 }
   0x9   :  { %p643_p2 = pnand %p641_p1, %p638_p0 }
   0xb   :  { %646 = shalt.err (!%p643_p2)
}
   0xc   :  { %s647_s16 = scalar_lea.vmem %s37_s28, 256  ;;  %p652_p4 = scmp.lt.s32.totalorder %s37_s28, %s37_s28 }
   0xd   :  { %p648_p3 = scmp.ne.s32.totalorder %s37_s28, %s647_s16  ;;  %p653_p5 = scmp.lt.s32.totalorder %s647_s16, %s647_s16 }
   0xf   :  { %p654_p6 = por %p653_p5, %p652_p4 }
  0x11   :  { %p655_p7 = pnand %p654_p6, %p648_p3 }
  0x13   :  { %658 = shalt.err (!%p655_p7)
}
  0x14   :  { %s803_s17 = smov 128   ;;  %s804_s18 = smov 8  }
  0x15   :  { %42 = dma.hbm_to_vmem [thread:$0]  %s1038_s1, 256, %s37_s28, [#allocation6], %s803_s17, %s803_s17, %s804_s18  }
  0x16   :  { %s659_s23 = scalar_lea.hbm %s1041_s4, 256 }
  0x17   :  { %p660_p8 = scmp.ne.s32.totalorder %s1041_s4, %s659_s23  ;;  %p663_p9 = scmp.lt.u32.totalorder %s659_s23, %s1041_s4 }
  0x19   :  { %p665_p10 = pnand %p663_p9, %p660_p8 }
  0x1b   :  { %668 = shalt.err (!%p665_p10)
}
  0x1c   :  { %s669_s29 = scalar_lea.vmem %s860_s30, 256  ;;  %p674_p12 = scmp.lt.s32.totalorder %s860_s30, %s860_s30 }
  0x1d   :  { %p670_p11 = scmp.ne.s32.totalorder %s860_s30, %s669_s29  ;;  %p675_p13 = scmp.lt.s32.totalorder %s669_s29, %s669_s29 }
  0x1f   :  { %p676_p0 = por %p675_p13, %p674_p12 }
  0x21   :  { %p677_p1 = pnand %p676_p0, %p670_p11 }
  0x23   :  { %680 = shalt.err (!%p677_p1)
}
  0x24   :  { %68 = dma.hbm_to_vmem [thread:$0]  %s1041_s4, 256, %s860_s30, [#allocation9], %s803_s17, %s803_s17, %s804_s18  }
  0x25   :  { %s805_s9 = smov [#allocation2]   ;;  %s806_s11 = smov [#allocation7]  }
  0x26   :  { %s24_s10 = sshll.u32 %s805_s9, 4  ;;  %s48_s12 = sshll.u32 %s806_s11, 4  ;;  %s25_s10 = int_to_ptr.vmem [resolvable:$true] %s24_s10  ;;  %s897_s12 = int_to_ptr.vmem [resolvable:$true] %s48_s12 }
  0x27   :  { %s681_s15 = scalar_lea.hbm %s1037_s0, 256 }
  0x28   :  { %p682_p2 = scmp.ne.s32.totalorder %s1037_s0, %s681_s15  ;;  %p685_p3 = scmp.lt.u32.totalorder %s681_s15, %s1037_s0 }
  0x2a   :  { %p687_p4 = pnand %p685_p3, %p682_p2 }
  0x2c   :  { %690 = shalt.err (!%p687_p4)
}
  0x2d   :  { %s691_s4 = scalar_lea.vmem %s25_s10, 256  ;;  %p696_p6 = scmp.lt.s32.totalorder %s25_s10, %s25_s10 }
  0x2e   :  { %p692_p5 = scmp.ne.s32.totalorder %s25_s10, %s691_s4  ;;  %p697_p7 = scmp.lt.s32.totalorder %s691_s4, %s691_s4 }
  0x30   :  { %p698_p8 = por %p697_p7, %p696_p6 }
  0x32   :  { %p699_p9 = pnand %p698_p8, %p692_p5 }
  0x34   :  { %702 = shalt.err (!%p699_p9)
}
  0x35   :  { %30 = dma.hbm_to_vmem [thread:$0]  %s1037_s0, 256, %s25_s10, [#allocation3], %s803_s17, %s803_s17, %s804_s18  }
  0x36   :  { %s703_s25 = scalar_lea.hbm %s1039_s2, 512 }
  0x37   :  { %p704_p10 = scmp.ne.s32.totalorder %s1039_s2, %s703_s25  ;;  %p707_p11 = scmp.lt.u32.totalorder %s703_s25, %s1039_s2 }
  0x39   :  { %p709_p12 = pnand %p707_p11, %p704_p10 }
  0x3b   :  { %712 = shalt.err (!%p709_p12)
}
  0x3c   :  { %s713_s28 = scalar_lea.vmem %s897_s12, 512  ;;  %p718_p0 = scmp.lt.s32.totalorder %s897_s12, %s897_s12 }
  0x3d   :  { %p714_p13 = scmp.ne.s32.totalorder %s897_s12, %s713_s28  ;;  %p719_p1 = scmp.lt.s32.totalorder %s713_s28, %s713_s28 }
  0x3f   :  { %p720_p2 = por %p719_p1, %p718_p0 }
  0x41   :  { %p721_p3 = pnand %p720_p2, %p714_p13 }
  0x43   :  { %724 = shalt.err (!%p721_p3)
}
  0x44   :  { %s807_s0 = smov 256   ;;  %s808_s17 = smov 16  }
  0x45   :  { %54 = dma.hbm_to_vmem [thread:$0]  %s1039_s2, 512, %s897_s12, [#allocation6], %s807_s0, %s807_s0, %s808_s17  }
  0x46   :  { %s809_s10 = smov [#allocation10]   ;;  %s725_s15 = scalar_lea.hbm %s1043_s6, 2048 }
  0x47   :  { %s76_s11 = sshll.u32 %s809_s10, 4  ;;  %p726_p4 = scmp.ne.s32.totalorder %s1043_s6, %s725_s15  ;;  %s77_s11 = int_to_ptr.vmem [resolvable:$true] %s76_s11 }
  0x48   :  { %p729_p5 = scmp.lt.u32.totalorder %s725_s15, %s1043_s6 }
  0x4a   :  { %p731_p6 = pnand %p729_p5, %p726_p4 }
  0x4c   :  { %734 = shalt.err (!%p731_p6)
}
  0x4d   :  { %s735_s4 = scalar_lea.vmem %s77_s11, 2048  ;;  %p740_p8 = scmp.lt.s32.totalorder %s77_s11, %s77_s11 }
  0x4e   :  { %p736_p7 = scmp.ne.s32.totalorder %s77_s11, %s735_s4  ;;  %p741_p9 = scmp.lt.s32.totalorder %s735_s4, %s735_s4 }
  0x50   :  { %p742_p10 = por %p741_p9, %p740_p8 }
  0x52   :  { %p743_p11 = pnand %p742_p10, %p736_p7 }
  0x54   :  { %746 = shalt.err (!%p743_p11)
}
  0x55   :  { %82 = dma.hbm_to_vmem [thread:$0]  %s1043_s6, 2048, %s77_s11, [#allocation9], %s807_s0, %s807_s0, %s808_s17  }
  0x56   :  { %791 = dma.done.wait [#allocation3], 256  }
  0x57   :  { %792 = vsyncadd [#allocation3], 4294967040 }
  0x58   :  { %793 = dma.done.wait [#allocation6], 768  }
  0x59   :  { %794 = vsyncadd [#allocation6], 4294966528 }
  0x5a   :  { %795 = dma.done.wait [#allocation9], 2304  }
  0x5b   :  { %796 = vsyncadd [#allocation9], 4294964992  ;;  %v810_v0 = vmov 0   ;;  %vm100_vm0 = vcmask 7168   ;;  %v98_v1 = vld [vmem:[%s1040_s3] sm:$0xff]  ;;  %v99_v2 = vld [vmem:[%s1040_s3 + $0x8] sm:$0xff] }
  0x5c   :  { %625 = vset.pattern.permute.xlu0 %v810_v0  ;;  %626 = vset.pattern.permute.xlu1 %v810_v0  ;;  %v101_v3 = vsel %vm100_vm0, %v98_v1, 0.0  ;;  %v108_v4 = vsel %vm100_vm0, %v99_v2, 0.0  ;;  %v326_v17 = vld [vmem:[#allocation10 + $0x8] sm:$0xff]  ;;  %v328_v18 = vld [vmem:[#allocation10 + $0x18] sm:$0xff]  ;;  %v325_v19 = vld [vmem:[#allocation10] sm:$0xff]  ;;  %v811_v49 = vmov 0.0  }
  0x5d   :  { %123 = vperm.xlu0 %625, %v98_v1   ;;  %v102_v5 = vrot.slane %v101_v3, 4  ;;  %v109_v6 = vrot.slane %v108_v4, 4  ;;  %v595_v20 = vpack.c.bf16 %v328_v18, %v326_v17  ;;  %v327_v21 = vld [vmem:[#allocation10 + $0x10] sm:$0xff]  ;;  %v330_v22 = vld [vmem:[#allocation10 + $0x28] sm:$0xff]  ;;  %v332_v23 = vld [vmem:[#allocation10 + $0x38] sm:$0xff]  ;;  %318 = vmatprep.mubr.f32.mxu0 %v811_v49  ;;  %vm133_vm1 = vcmask 130048  }
  0x5e   :  { %v597_v24 = vpack.c.bf16 %v327_v21, %v325_v19  ;;  %v599_v25 = vpack.c.bf16 %v332_v23, %v330_v22  ;;  %v329_v26 = vld [vmem:[#allocation10 + $0x20] sm:$0xff]  ;;  %v331_v27 = vld [vmem:[#allocation10 + $0x30] sm:$0xff]  ;;  %v334_v28 = vld [vmem:[#allocation10 + $0x48] sm:$0xff]  ;;  %410 = vmatprep.mubr.f32.mxu1 %v811_v49  ;;  %vm221_vm2 = vcmask 261120   ;;  %vm164_vm3 = vcmask 523264  }
  0x5f   :  { %v103_v7 = vadd.f32 %v102_v5, %v101_v3  ;;  %v110_v8 = vadd.f32 %v109_v6, %v108_v4  ;;  %596 = vmatprep.subr.bf16.mxu1 %v595_v20  ;;  %v336_v29 = vld [vmem:[#allocation10 + $0x58] sm:$0xff]  ;;  %v601_v30 = vpack.c.bf16 %v331_v27, %v329_v26  ;;  %v333_v32 = vld [vmem:[#allocation10 + $0x40] sm:$0xff]  ;;  %v335_v33 = vld [vmem:[#allocation10 + $0x50] sm:$0xff]  ;;  %vm240_vm4 = vcmask 1041409  }
  0x60   :  { %598 = vmatpush1.bf16.msra.mxu1 %v597_v24  ;;  %v603_v31 = vpack.c.bf16 %v336_v29, %v334_v28  ;;  %v605_v35 = vpack.c.bf16 %v335_v33, %v333_v32  ;;  %v246_v36 = vld [vmem:[%s1042_s5 + $0x8] sm:$0xff]  ;;  %v248_v37 = vld [vmem:[%s1042_s5 + $0x18] sm:$0xff]  ;;  %v245_v43 = vld [vmem:[%s1042_s5] sm:$0xff]  ;;  %vm425_vm5 = vcmask 1041408   ;;  %vm243_vm6 = vcmask 254976  }
  0x61   :  { %128 = vperm.xlu0 %625, %v99_v2   ;;  %v104_v9 = vrot.slane %v103_v7, 2  ;;  %v111_v10 = vrot.slane %v110_v8, 2  ;;  %600 = vmatprep.subr.bf16.mxu1 %v599_v25  ;;  %v338_v38 = vld [vmem:[#allocation10 + $0x68] sm:$0xff]  ;;  %v591_v39 = vpack.c.bf16 %v248_v37, %v246_v36  ;;  %v340_v40 = vld [vmem:[#allocation10 + $0x78] sm:$0xff]  ;;  %v247_v44 = vld [vmem:[%s1042_s5 + $0x10] sm:$0xff]  ;;  %s812_s5 = smov [#allocation12]  }
  0x62   :  { %v607_v42 = vpack.c.bf16 %v340_v40, %v338_v38  ;;  %v337_v45 = vld [vmem:[#allocation10 + $0x60] sm:$0xff]  ;;  %v593_v46 = vpack.c.bf16 %v247_v44, %v245_v43  ;;  %v339_v47 = vld [vmem:[#allocation10 + $0x70] sm:$0xff]  ;;  %v182_v53 = vld [vmem:[#allocation7 + $0x8] sm:$0xff]  ;;  %s574_s0 = sshll.u32 %s812_s5, 4  ;;  %s575_s0 = int_to_ptr.vmem [resolvable:$true] %s574_s0 }
  0x63   :  { %v105_v11 = vadd.f32 %v104_v9, %v103_v7  ;;  %v112_v12 = vadd.f32 %v111_v10, %v110_v8  ;;  %592 = vmatprep.subr.bf16.mxu0 %v591_v39  ;;  %v609_v48 = vpack.c.bf16 %v339_v47, %v337_v45  ;;  %v181_v50 = vld [vmem:[#allocation7] sm:$0xff]  ;;  %v160_v55 = vld [vmem:[#allocation5] sm:$0xff]  ;;  %v184_v61 = vld [vmem:[#allocation7 + $0x18] sm:$0xff]  ;;  %s747_s17 = scalar_lea.vmem %s575_s0, 32  ;;  %p752_p13 = scmp.lt.s32.totalorder %s575_s0, %s575_s0 }
  0x64   :  { %602 = vmatpush1.bf16.msra.mxu1 %v601_v30  ;;  %594 = vmatpush1.bf16.msra.mxu0 %v593_v46  ;;  %v217_v51 = vld [vmem:[#allocation8] sm:$0xff]  ;;  %v183_v60 = vld [vmem:[#allocation7 + $0x10] sm:$0xff]  ;;  %v218_v62 = vld [vmem:[#allocation8 + $0x8] sm:$0xff]  ;;  %p748_p12 = scmp.ne.s32.totalorder %s575_s0, %s747_s17  ;;  %p753_p0 = scmp.lt.s32.totalorder %s747_s17, %s747_s17 }
  0x65   :  { %v106_v13 = vrot.slane %v105_v11, 1  ;;  %v113_v14 = vrot.slane %v112_v12, 1  ;;  %604 = vmatprep.subr.bf16.mxu1 %v603_v31  ;;  %v119_v52 = vld [vmem:[#allocation2] sm:$0xff]  ;;  %v120_v63 = vld [vmem:[#allocation2 + $0x8] sm:$0xff] }
  0x66   :  { %p754_p1 = por %p753_p0, %p752_p13 }
  0x67   :  { %v107_v15 = vadd.f32 %v106_v13, %v105_v11  ;;  %v114_v16 = vadd.f32 %v113_v14, %v112_v12  ;;  %v161_v14 = vld [vmem:[#allocation5 + $0x8] sm:$0xff] }
  0x68   :  { %606 = vmatpush1.bf16.msra.mxu1 %v605_v35  ;;  %p755_p2 = pnand %p754_p1, %p748_p12 }
  0x69   :  { %627 = vrcp.f32 %v107_v15  ;;  %608 = vmatprep.subr.bf16.mxu1 %v607_v42 }
  0x6a   :  { %629 = vrcp.f32 %v114_v16 }
  0x6c   :  { %610 = vmatpush1.bf16.msra.mxu1 %v609_v48 }
  0x73   :  { %v628_v34 = vpop.eup %627 }
  0x74   :  { %150 = vperm.xlu1 %626, %v628_v34   ;;  %v630_v41 = vpop.eup %629 }
  0x78   :  { %155 = vperm.xlu1 %626, %v630_v41  }
  0xdc   :  { %v124_v54 = vpop.permute.xlu0 %123 }
  0xdd   :  { %v185_v56 = vmul.f32 %v181_v50, %v124_v54  ;;  %v219_v57 = vmul.f32 %v217_v51, %v124_v54  ;;  %v131_v58 = vmul.f32 %v124_v54, %v119_v52  ;;  %v186_v59 = vmul.f32 %v182_v53, %v124_v54 }
  0xde   :  { %v162_v1 = vmul.f32 %v160_v55, %v124_v54 }
  0xdf   :  { %v134_v0 = vsel %vm133_vm1, %v131_v58, 0.0  ;;  %v222_v2 = vsel %vm221_vm2, %v219_v57, 0.0  ;;  %v189_v4 = vrot.slane %v185_v56, 4  ;;  %v195_v8 = vrot.slane %v186_v59, 4 }
  0xe0   :  { %v129_v3 = vpop.permute.xlu0 %128  ;;  %v135_v7 = vrot.slane %v134_v0, 4  ;;  %v223_v11 = vrot.slane %v222_v2, 4  ;;  %v165_v15 = vsel %vm164_vm3, %v162_v1, 0.0 }
  0xe1   :  { %v187_v5 = vmul.f32 %v183_v60, %v129_v3  ;;  %v188_v6 = vmul.f32 %v184_v61, %v129_v3  ;;  %v220_v9 = vmul.f32 %v218_v62, %v129_v3  ;;  %v132_v10 = vmul.f32 %v129_v3, %v120_v63 }
  0xe2   :  { %v190_v18 = vadd.f32 %v189_v4, %v185_v56  ;;  %v136_v20 = vadd.f32 %v135_v7, %v134_v0  ;;  %v196_v22 = vadd.f32 %v195_v8, %v186_v59  ;;  %v163_v24 = vmul.f32 %v161_v14, %v129_v3 }
  0xe3   :  { %v201_v12 = vrot.slane %v187_v5, 4  ;;  %v207_v13 = vrot.slane %v188_v6, 4  ;;  %v229_v16 = vsel %vm221_vm2, %v220_v9, 0.0  ;;  %v141_v17 = vsel %vm133_vm1, %v132_v10, 0.0 }
  0xe4   :  { %v230_v19 = vrot.slane %v229_v16, 4  ;;  %v142_v21 = vrot.slane %v141_v17, 4  ;;  %v166_v25 = vrot.slane %v165_v15, 4  ;;  %v224_v26 = vadd.f32 %v223_v11, %v222_v2 }
  0xe5   :  { %v202_v23 = vadd.f32 %v201_v12, %v187_v5  ;;  %v208_v27 = vadd.f32 %v207_v13, %v188_v6  ;;  %v172_v31 = vsel %vm164_vm3, %v163_v24, 0.0  ;;  %v191_v32 = vrot.slane %v190_v18, 2 }
  0xe6   :  { %v231_v28 = vadd.f32 %v230_v19, %v229_v16  ;;  %v143_v29 = vadd.f32 %v142_v21, %v141_v17  ;;  %v167_v30 = vadd.f32 %v166_v25, %v165_v15  ;;  %v137_v33 = vrot.slane %v136_v20, 2 }
  0xe7   :  { %v173_v34 = vrot.slane %v172_v31, 4  ;;  %v197_v35 = vrot.slane %v196_v22, 2  ;;  %v203_v36 = vrot.slane %v202_v23, 2  ;;  %v225_v39 = vrot.slane %v224_v26, 2 }
  0xe8   :  { %v144_v37 = vrot.slane %v143_v29, 2  ;;  %v168_v38 = vrot.slane %v167_v30, 2  ;;  %v209_v40 = vrot.slane %v208_v27, 2  ;;  %v232_v41 = vrot.slane %v231_v28, 2 }
  0xe9   :  { %v174_v42 = vadd.f32 %v173_v34, %v172_v31  ;;  %v138_v43 = vadd.f32 %v137_v33, %v136_v20  ;;  %v192_v45 = vadd.f32 %v191_v32, %v190_v18  ;;  %v198_v48 = vadd.f32 %v197_v35, %v196_v22 }
  0xea   :  { %v145_v46 = vadd.f32 %v144_v37, %v143_v29  ;;  %v169_v47 = vadd.f32 %v168_v38, %v167_v30  ;;  %v204_v49 = vadd.f32 %v203_v36, %v202_v23  ;;  %v210_v51 = vadd.f32 %v209_v40, %v208_v27 }
  0xeb   :  { %v175_v44 = vrot.slane %v174_v42, 2  ;;  %v226_v52 = vadd.f32 %v225_v39, %v224_v26  ;;  %v233_v53 = vadd.f32 %v232_v41, %v231_v28  ;;  %v139_v54 = vrot.slane %v138_v43, 1 }
  0xec   :  { %v193_v55 = vrot.slane %v192_v45, 1  ;;  %v146_v56 = vrot.slane %v145_v46, 1  ;;  %v170_v57 = vrot.slane %v169_v47, 1  ;;  %v199_v58 = vrot.slane %v198_v48, 1 }
  0xed   :  { %v176_v50 = vadd.f32 %v175_v44, %v174_v42  ;;  %v205_v59 = vrot.slane %v204_v49, 1  ;;  %v211_v61 = vrot.slane %v210_v51, 1  ;;  %v227_v62 = vrot.slane %v226_v52, 1 }
  0xee   :  { %v234_v63 = vrot.slane %v233_v53, 1  ;;  %v140_v1 = vadd.f32 %v139_v54, %v138_v43  ;;  %v194_v2 = vadd.f32 %v193_v55, %v192_v45  ;;  %v147_v3 = vadd.f32 %v146_v56, %v145_v46 }
  0xef   :  { %v177_v60 = vrot.slane %v176_v50, 1  ;;  %v171_v4 = vadd.f32 %v170_v57, %v169_v47  ;;  %v200_v5 = vadd.f32 %v199_v58, %v198_v48  ;;  %v206_v6 = vadd.f32 %v205_v59, %v204_v49 }
  0xf0   :  { %v212_v8 = vadd.f32 %v211_v61, %v210_v51  ;;  %v228_v9 = vadd.f32 %v227_v62, %v226_v52  ;;  %v235_v10 = vadd.f32 %v234_v63, %v233_v53 }
  0xf1   :  { %v178_v7 = vadd.f32 %v177_v60, %v176_v50 }
  0xf3   :  { %v151_v0 = vpop.permute.xlu1 %150 }
  0xf4   :  { %v158_v12 = vmul.f32 %v151_v0, %v140_v1  ;;  %v179_v13 = vmul.f32 %v171_v4, %v151_v0  ;;  %v967_v14 = vmul.f32 %v194_v2, %v151_v0  ;;  %v969_v15 = vmul.f32 %v200_v5, %v151_v0 }
  0xf5   :  { %v236_v20 = vmul.f32 %v228_v9, %v151_v0 }
  0xf7   :  { %v156_v11 = vpop.permute.xlu1 %155 }
  0xf8   :  { %v159_v16 = vmul.f32 %v156_v11, %v147_v3  ;;  %v180_v17 = vmul.f32 %v178_v7, %v156_v11  ;;  %v971_v18 = vmul.f32 %v206_v6, %v156_v11  ;;  %v973_v19 = vmul.f32 %v212_v8, %v156_v11 }
  0xf9   :  { %v237_v21 = vmul.f32 %v235_v10, %v156_v11 }
  0xfa   :  { %v251_v22 = vsel %vm240_vm4, %v159_v16, %v158_v12  ;;  %v343_v23 = vsel %vm240_vm4, %v180_v17, %v179_v13  ;;  %v421_v24 = vsel %vm240_vm4, %v971_v18, %v967_v14  ;;  %v422_v25 = vsel %vm240_vm4, %v973_v19, %v969_v15 }
  0xfb   :  { %589 = vmatmul.mubr.msk.f32.vlgmr.msra.gmra.mrb[0].mxu0 %vm133_vm1, %v251_v22  ;;  %590 = vmatmul.mubr.msk.f32.vlgmr.msra.gmra.mrb[0].mxu1 %vm164_vm3, %v343_v23  ;;  %v431_v26 = vsel %vm425_vm5, %v421_v24, -inf  ;;  %v432_v27 = vsel %vm425_vm5, %v422_v25, -inf  ;;  %v426_v28 = vsel %vm425_vm5, %v421_v24, inf  ;;  %v427_v29 = vsel %vm425_vm5, %v422_v25, inf }
  0xfc   :  { %v433_v30 = vmax.f32 %v431_v26, %v432_v27  ;;  %v428_v31 = vmin.f32 %v426_v28, %v427_v29  ;;  %v241_v32 = vsel %vm240_vm4, %v237_v21, %v236_v20 }
  0xfd   :  { %244 = vst.msk [vmem:[#allocation12] sm:$0x3] %vm243_vm6, %v241_v32 }
  0xfe   :  { %434 = vmax.xlane.f32.xlu1 %v433_v30  ;;  %429 = vmin.xlane.f32.xlu0 %v428_v31 }
 0x1ce   :  { %v990_v33 = vpop.f32.mrb[0].mxu0  ;;  %v412_v34 = vpop.f32.mrb[0].mxu1 }
 0x1cf   :  { %v992_v35 = vpop.f32.mrb[1].mxu0  ;;  %v414_v36 = vpop.f32.mrb[1].mxu1  ;;  %v492_v37 = vsel %vm425_vm5, %v990_v33, inf  ;;  %v460_v38 = vsel %vm425_vm5, %v412_v34, inf  ;;  %v465_v39 = vsel %vm425_vm5, %v412_v34, -inf  ;;  %v497_v40 = vsel %vm425_vm5, %v990_v33, -inf }
 0x1d0   :  { %v493_v41 = vsel %vm425_vm5, %v992_v35, inf  ;;  %v498_v42 = vsel %vm425_vm5, %v992_v35, -inf  ;;  %v461_v43 = vsel %vm425_vm5, %v414_v36, inf  ;;  %v466_v44 = vsel %vm425_vm5, %v414_v36, -inf }
 0x1d1   :  { %v494_v45 = vmin.f32 %v492_v37, %v493_v41  ;;  %v462_v46 = vmin.f32 %v460_v38, %v461_v43  ;;  %v467_v47 = vmax.f32 %v465_v39, %v466_v44  ;;  %v499_v48 = vmax.f32 %v497_v40, %v498_v42 }
 0x1d3   :  { %495 = vmin.xlane.f32.xlu1 %v494_v45  ;;  %463 = vmin.xlane.f32.xlu0 %v462_v46 }
 0x1d7   :  { %468 = vmax.xlane.f32.xlu0 %v467_v47 }
 0x1db   :  { %500 = vmax.xlane.f32.xlu0 %v499_v48 }
 0x1dc   :  { %758 = shalt.err (!%p755_p2)
}
 0x1dd   :  { %s759_s10 = scalar_lea.hbm %s1045_s8, 32 }
 0x1de   :  { %p760_p3 = scmp.ne.s32.totalorder %s1045_s8, %s759_s10  ;;  %p763_p4 = scmp.lt.u32.totalorder %s759_s10, %s1045_s8 }
 0x1e0   :  { %p765_p5 = pnand %p763_p4, %p760_p3 }
 0x1e2   :  { %768 = shalt.err (!%p765_p5)
}
 0x1e3   :  { %577 = dma.vmem_to_hbm [thread:$0]  %s575_s0, 32, %s1045_s8, [#allocation13]   ;;  %v435_v49 = vpop.xlane.xlu1 %434  ;;  %v430_v50 = vpop.xlane.xlu0 %429  ;;  %vm550_vm7 = vcmask 1043459   ;;  %vm552_vm8 = vcmask 1045509   ;;  %vm554_vm9 = vcmask 1047559  }
 0x1e4   :  { %v444_v51 = vsub.f32 %v435_v49, %v430_v50  ;;  %v437_v62 = vrot.slane %v430_v50, 1  ;;  %v440_v3 = vsub.f32 %v967_v14, %v430_v50  ;;  %v441_v4 = vsub.f32 %v969_v15, %v430_v50  ;;  %s814_s8 = smov [#allocation11]  }
 0x1e5   :  { %v813_v15 = vmov 1983009808   ;;  %s564_s20 = sshll.u32 %s814_s8, 4  ;;  %s565_s20 = int_to_ptr.vmem [resolvable:$true] %s564_s20 }
 0x1e6   :  { %v445_v53 = vadd.f32 1e-07, %v444_v51  ;;  %v442_v5 = vsub.f32 %v971_v18, %v437_v62  ;;  %v443_v6 = vsub.f32 %v973_v19, %v437_v62  ;;  %v530_v23 = vunpack.c.l.s4 %v813_v15  ;;  %s769_s21 = scalar_lea.vmem %s565_s20, 64  ;;  %p774_p7 = scmp.lt.s32.totalorder %s565_s20, %s565_s20 }
 0x1e7   :  { %v532_v18 = vlaneseq  ;;  %p770_p6 = scmp.ne.s32.totalorder %s565_s20, %s769_s21  ;;  %p775_p8 = scmp.lt.s32.totalorder %s769_s21, %s769_s21 }
 0x1e8   :  { %631 = vrcp.f32 %v445_v53 }
 0x1e9   :  { %v533_v37 = vshrl.u32 %v532_v18, 7  ;;  %p776_p9 = por %p775_p8, %p774_p7 }
 0x1eb   :  { %p777_p10 = pnand %p776_p9, %p770_p6 }
 0x1f2   :  { %v632_v61 = vpop.eup %631 }
 0x1f3   :  { %v449_v63 = vrot.slane %v632_v61, 1  ;;  %v452_v9 = vmul.f32 %v632_v61, %v440_v3  ;;  %v453_v10 = vmul.f32 %v632_v61, %v441_v4 }
 0x1f5   :  { %v454_v11 = vmul.f32 %v449_v63, %v442_v5  ;;  %v455_v12 = vmul.f32 %v449_v63, %v443_v6  ;;  %v456_v24 = vmul.f32 0.1, %v452_v9  ;;  %v457_v19 = vmul.f32 0.1, %v453_v10 }
 0x1f7   :  { %v458_v27 = vmul.f32 0.1, %v454_v11  ;;  %v459_v28 = vmul.f32 0.1, %v455_v12 }
 0x260   :  { %v464_v52 = vpop.xlane.xlu0 %463  ;;  %v496_v57 = vpop.xlane.xlu1 %495 }
 0x261   :  { %v470_v0 = vsub.f32 %v412_v34, %v464_v52  ;;  %v471_v1 = vsub.f32 %v414_v36, %v464_v52  ;;  %v502_v20 = vsub.f32 %v990_v33, %v496_v57  ;;  %v503_v21 = vsub.f32 %v992_v35, %v496_v57 }
 0x262   :  { %v531_v33 = vunpack.c.0.s8 %v530_v23 }
 0x264   :  { %v469_v54 = vpop.xlane.xlu0 %468  ;;  %v534_v44 = vsub.s32 %v531_v33, %v533_v37 }
 0x265   :  { %v472_v55 = vsub.f32 %v469_v54, %v464_v52 }
 0x267   :  { %v473_v56 = vadd.f32 1e-07, %v472_v55 }
 0x268   :  { %v501_v58 = vpop.xlane.xlu0 %500 }
 0x269   :  { %633 = vrcp.f32 %v473_v56  ;;  %v504_v59 = vsub.f32 %v501_v58, %v496_v57 }
 0x26b   :  { %v505_v60 = vadd.f32 1e-07, %v504_v59 }
 0x26d   :  { %635 = vrcp.f32 %v505_v60 }
 0x273   :  { %v634_v2 = vpop.eup %633 }
 0x274   :  { %v476_v7 = vmul.f32 %v634_v2, %v470_v0  ;;  %v477_v8 = vmul.f32 %v634_v2, %v471_v1 }
 0x276   :  { %v478_v13 = vmul.f32 0.3, %v476_v7  ;;  %v479_v16 = vmul.f32 0.3, %v477_v8 }
 0x277   :  { %v636_v17 = vpop.eup %635 }
 0x278   :  { %v482_v14 = vrot.slane %v478_v13, 1  ;;  %v483_v22 = vrot.slane %v479_v16, 1  ;;  %v508_v25 = vmul.f32 %v636_v17, %v502_v20  ;;  %v509_v26 = vmul.f32 %v636_v17, %v503_v21 }
 0x279   :  { %v488_v29 = vadd.f32 %v478_v13, %v456_v24  ;;  %v489_v30 = vadd.f32 %v479_v16, %v457_v19 }
 0x27a   :  { %v510_v31 = vmul.f32 0.6, %v508_v25  ;;  %v511_v32 = vmul.f32 0.6, %v509_v26  ;;  %v490_v34 = vadd.f32 %v482_v14, %v458_v27  ;;  %v491_v36 = vadd.f32 %v483_v22, %v459_v28 }
 0x27c   :  { %v514_v35 = vrot.slane %v510_v31, 1  ;;  %v515_v38 = vrot.slane %v511_v32, 1  ;;  %v520_v39 = vadd.f32 %v510_v31, %v488_v29  ;;  %v521_v40 = vadd.f32 %v511_v32, %v489_v30 }
 0x27e   :  { %v522_v41 = vadd.f32 %v514_v35, %v490_v34  ;;  %v523_v42 = vadd.f32 %v515_v38, %v491_v36  ;;  %v528_v43 = vcombine.low %v520_v39, %v521_v40 }
 0x280   :  { %v536_v45 = vcombine.low %v522_v41, %v523_v42  ;;  %v535_v47 = vrot.slane %v528_v43, %v534_v44 }
 0x282   :  { %v543_v46 = vrot.slane %v536_v45, %v534_v44 }
 0x284   :  { %v548_v48 = vrot.slane %v543_v46, 7 }
 0x286   :  { %v549_v49 = vsel %vm240_vm4, %v548_v48, %v535_v47 }
 0x287   :  { %v551_v50 = vsel %vm550_vm7, %v548_v48, %v549_v49 }
 0x288   :  { %v553_v51 = vsel %vm552_vm8, %v548_v48, %v551_v50 }
 0x289   :  { %v555_v52 = vsel %vm554_vm9, %v548_v48, %v553_v51 }
 0x28a   :  { %557 = vst [vmem:[#allocation11] sm:$0xf] %v555_v52 }
 0x28b   :  { %780 = shalt.err (!%p777_p10)
}
 0x28c   :  { %s781_s12 = scalar_lea.hbm %s1044_s7, 64 }
 0x28d   :  { %p782_p11 = scmp.ne.s32.totalorder %s1044_s7, %s781_s12  ;;  %p785_p12 = scmp.lt.u32.totalorder %s781_s12, %s1044_s7 }
 0x28f   :  { %p787_p13 = pnand %p785_p12, %p782_p11 }
 0x291   :  { %790 = shalt.err (!%p787_p13)
}
 0x292   :  { %567 = dma.vmem_to_hbm [thread:$0]  %s565_s20, 64, %s1044_s7, [#allocation4]  }
 0x293   :  { %797 = dma.done.wait [#allocation4], 64  }
 0x294   :  { %798 = vsyncadd [#allocation4], 4294967232 }
 0x295   :  { %799 = dma.done.wait [#allocation13], 32  }
 0x296   :  { %800 = vsyncadd [#allocation13], 4294967264 }
 0x297   :  { %584 = vsyncpa [#allocation3], 1 }
 0x298   :  { %585 = vsyncpa [#allocation6], 1 }
 0x299   :  { %586 = vsyncpa [#allocation9], 1 }
 0x29a   :  { %587 = vsyncpa [#allocation4], 1 }
 0x29b   :  { %588 = vsyncpa [#allocation13], 1 }

</bundles_post_ra>
